<compile_context>
chip_gen: v6e
topology: v6e:2x2x1
jax: 0.10.0
libtpu: 0.0.40
codegen_flags: <defaults>
</compile_context>

<pallas_src>
import jax
import jax.numpy as jnp
from jax import lax
from jax.experimental import pallas as pl
from jax.experimental.pallas import tpu as pltpu


_VMEM_BUDGET_BYTES = 20 * 1024 * 1024   # estimated-footprint budget for tile sizing
_VMEM_LIMIT_BYTES = 32 * 1024 * 1024    # scoped limit: raise on v5e, default on v6e/v7x


def _score_kernel(hc_ref, tok_ref, wt_ref, ws_ref, bs_ref, out_ref):
    """One (batch row, class tile) grid step.

    hc_ref : (1, H)       f32  precomputed  cat(hidden, context) @ W[:, :2H]^T + b_w
    tok_ref: (TILE_C, H)  f32  token-embeddings tile (streamed in HBM dtype)
    wt_ref : (H, H)       cdt  W[:, 2H:]^T  (token-part weight, transposed)
    ws_ref : (1, H)       cdt  score-layer weight row
    bs_ref : (1, 1)       f32  score-layer bias
    out_ref: (1, TILE_C)  f32  scores (lane-dense row)
    """
    cdt = wt_ref.dtype
    # Token part of the first Linear on the MXU with f32 accumulation.  The cast
    # to the compute dtype happens here (in VMEM/registers), not as a separate
    # HBM pass in the wrapper.
    u = jnp.dot(tok_ref[...].astype(cdt), wt_ref[...],
                preferred_element_type=jnp.float32)
    # Add the per-batch-row hidden/context partial product; bias already folded in.
    u = u + hc_ref[...]
    # leaky_relu with PyTorch default negative_slope = 0.01 (f32 on the VPU).
    a = jnp.maximum(u, 0.01 * u)
    # Final H -> 1 projection as ws @ a^T  ->  (1, TILE_C): lane-dense output row
    # instead of a width-1 column.  Operands in the compute dtype so the MXU is
    # single-pass and any rhs relayout moves half the bytes.
    s = lax.dot_general(
        ws_ref[...], a.astype(cdt),
        dimension_numbers=(((1,), (1,)), ((), ())),
        preferred_element_type=jnp.float32,
    )
    out_ref[...] = s + bs_ref[...]


def _pick_class_tile(C, H, requested, compute_itemsize, budget_bytes):
    """Pick the class-tile size against a VMEM budget (all Python ints).

    Estimated VMEM bytes per class row of a tile:
      8H  double-buffered f32 token DMA buffers
      2H  in-kernel compute-dtype copy of the token tile
      8H  f32 pre-activation / activation temporaries
    plus a fixed cost for the (H, H) weight buffers and small operands.
    """
    per_row = 18 * H + 32
    fixed = 2 * H * H * compute_itemsize + 8 * H * 4
    cap = max(128, (budget_bytes - fixed) // per_row)
    tile = max(128, (min(requested, cap) // 128) * 128)   # mult. of 128 -> lane-dense
    if C <= tile:
        return C, 1          # single full-width tile (block == full dim: always legal)
    return tile, pl.cdiv(C, tile)   # ragged last tile handled by Pallas masking


def score_model_forward(hidden, context, token_embeddings,
                        w_weight, w_bias, score_weight, score_bias,
                        *, tile_c=4096, compute_dtype=jnp.bfloat16):
    """Forward pass of ScoreModel.

    hidden, context  : (B, H) f32
    token_embeddings : (B, C, H) f32 (streamed as-is; cast happens in-kernel)
    w_weight         : (H, 3H)  torch nn.Linear layout (out, in)
    w_bias           : (H,)
    score_weight     : (1, H)
    score_bias       : (1,)
    returns          : (B, C) f32
    """
    B, C, H = token_embeddings.shape
    assert hidden.shape == (B, H) and context.shape == (B, H)

    w_weight = w_weight.astype(jnp.float32)
    w_hc = w_weight[:, : 2 * H]        # (H, 2H)  hidden/context columns
    w_tok = w_weight[:, 2 * H:]        # (H, H)   token columns

    # Tiny per-batch-row precompute (replaces the repeated-hc concat entirely).
    hc = jnp.concatenate(
        [hidden.astype(jnp.float32), context.astype(jnp.float32)], axis=-1)  # (B, 2H)
    hc_part = (jnp.dot(hc, w_hc.T, precision=lax.Precision.HIGHEST)
               + w_bias.astype(jnp.float32)).reshape(B, 1, H)

    # Small operands only are pre-cast; the big token stream is NOT touched here.
    wt_tok = w_tok.T.astype(compute_dtype)                 # (H, H)
    ws = score_weight.reshape(1, H).astype(compute_dtype)  # (1, H)
    bs = score_bias.reshape(1, 1).astype(jnp.float32)      # (1, 1)

    itemsize = jnp.dtype(compute_dtype).itemsize
    tok_itemsize = jnp.dtype(token_embeddings.dtype).itemsize
    tc, n_ct = _pick_class_tile(C, H, tile_c, itemsize, _VMEM_BUDGET_BYTES)

    cost = pl.CostEstimate(
        flops=int(2 * B * C * H * H + 2 * B * C * H),
        transcendentals=0,
        bytes_accessed=int(B * C * H * tok_itemsize    # token stream (single pass)
                           + H * H * itemsize          # token-part weight
                           + B * H * 4                 # hc partial
                           + B * C * 4),               # output
    )

    def _build(single_buffer_invariants):
        # Grid-invariant operands (same block index at every grid step) get a
        # single buffer: double-buffering a weight that is DMA'd once only wastes
        # VMEM.  hc changes per batch row, so it keeps default buffering.
        inv = pl.Buffered(1) if single_buffer_invariants else None

        def spec(shape, imap, mode=None):
            if mode is None:
                return pl.BlockSpec(shape, imap)
            return pl.BlockSpec(shape, imap, pipeline_mode=mode)

        in_specs = [
            spec((None, 1, H), lambda b, c: (b, 0, 0)),          # hc partial (per-b)
            spec((None, tc, H), lambda b, c: (b, c, 0)),         # token tile (hot stream)
            spec((H, H), lambda b, c: (0, 0), inv),              # wt (grid-invariant)
            spec((1, H), lambda b, c: (0, 0), inv),              # score weight
            spec((1, 1), lambda b, c: (0, 0), inv),              # score bias
        ]
        out_spec = pl.BlockSpec((None, 1, tc), lambda b, c: (b, 0, c))
        return pl.pallas_call(
            _score_kernel,
            out_shape=jax.ShapeDtypeStruct((B, 1, C), jnp.float32),
            grid=(B, n_ct),
            in_specs=in_specs,
            out_specs=out_spec,
            compiler_params=pltpu.CompilerParams(
                dimension_semantics=("parallel", "parallel"),
                vmem_limit_bytes=_VMEM_LIMIT_BYTES),
            cost_estimate=cost,
        )

    try:
        out = _build(True)(hc_part, token_embeddings, wt_tok, ws, bs)
    except Exception:
        # pl.Buffered(1) not supported by this JAX/libtpu build -> default buffering.
        out = _build(False)(hc_part, token_embeddings, wt_tok, ws, bs)

    return out.reshape(B, C)


if __name__ == "__main__":
    # Small deterministic example consistent with the module: B=2, class_size=8, H=32.
    B, C, H = 2, 8, 32
    key = jax.random.PRNGKey(0)
    k1, k2, k3, k4, k5, k6, k7 = jax.random.split(key, 7)

    hidden = jax.random.normal(k1, (B, H), dtype=jnp.float32)
    context = jax.random.normal(k2, (B, H), dtype=jnp.float32)
    token_embeddings = jax.random.normal(k3, (B, C, H), dtype=jnp.float32)

    # nn.Linear shapes: weight (out, in), bias (out,)
    w_weight = jax.random.normal(k4, (H, 3 * H), dtype=jnp.float32) * 0.1
    w_bias = jax.random.normal(k5, (H,), dtype=jnp.float32) * 0.1
    score_weight = jax.random.normal(k6, (1, H), dtype=jnp.float32) * 0.1
    score_bias = jax.random.normal(k7, (1,), dtype=jnp.float32) * 0.1

    # Run both the f32 path (strict check) and the default bf16 path (loose check).
    out_f32 = score_model_forward(hidden, context, token_embeddings,
                                  w_weight, w_bias, score_weight, score_bias,
                                  compute_dtype=jnp.float32)
    out_bf16 = score_model_forward(hidden, context, token_embeddings,
                                   w_weight, w_bias, score_weight, score_bias)
    out_f32, out_bf16 = jax.block_until_ready((out_f32, out_bf16))

    # Pure-JAX reference mirroring the PyTorch module exactly.
    hc = jnp.concatenate([hidden, context], axis=-1)                          # (B, 2H)
    e = jnp.concatenate(
        [jnp.broadcast_to(hc[:, None, :], (B, C, 2 * H)), token_embeddings],
        axis=-1)                                                              # (B, C, 3H)
    h = jnp.dot(e.reshape(-1, 3 * H), w_weight.T,
                precision=lax.Precision.HIGHEST).reshape(B, C, H) + w_bias
    h = jnp.where(h > 0, h, 0.01 * h)                                         # leaky_relu
    ref = (jnp.dot(h.reshape(-1, H), score_weight.T,
                   precision=lax.Precision.HIGHEST).reshape(B, C) + score_bias[0])

    assert out_f32.shape == (B, C) and out_bf16.shape == (B, C)
    assert jnp.allclose(out_f32, ref, atol=1e-3, rtol=1e-3), "f32 kernel mismatch"
    assert jnp.allclose(out_bf16, ref, atol=5e-2, rtol=5e-2), "bf16 kernel mismatch"
    print("KERNEL_OK")
</pallas_src>

<mosaic_0001>
module attributes {stable_mosaic.version = 11 : i64} {
  func.func @_score_kernel(%arg0: i32, %arg1: i32, %arg2: memref<1x1x32xf32, #tpu.memory_space<vmem>>, %arg3: memref<1x8x32xf32, #tpu.memory_space<vmem>>, %arg4: memref<32x32xf32, #tpu.memory_space<vmem>>, %arg5: memref<1x32xf32, #tpu.memory_space<vmem>>, %arg6: memref<1x1xf32, #tpu.memory_space<vmem>>, %arg7: memref<1x1x8xf32, #tpu.memory_space<vmem>>) attributes {dimension_semantics = [#tpu.dimension_semantics<parallel>, #tpu.dimension_semantics<parallel>], iteration_bounds = array<i64: 2, 1>, scalar_prefetch = 0 : i64, scratch_operands = 0 : i64, tpu.core_type = #tpu.core_type<tc>, window_params = [{transform_indices = @transform_0, window_bounds = array<i64: 1, 1, 32>}, {transform_indices = @transform_1, window_bounds = array<i64: 1, 8, 32>}, {pipeline_mode = #tpu.pipeline_mode<synchronous>, transform_indices = @transform_2, window_bounds = array<i64: 32, 32>}, {pipeline_mode = #tpu.pipeline_mode<synchronous>, transform_indices = @transform_3, window_bounds = array<i64: 1, 32>}, {pipeline_mode = #tpu.pipeline_mode<synchronous>, transform_indices = @transform_4, window_bounds = array<i64: 1, 1>}, {transform_indices = @transform_5, window_bounds = array<i64: 1, 1, 8>}]} {
    %c0 = arith.constant 0 : index
    %c0_0 = arith.constant 0 : index
    %c0_1 = arith.constant 0 : index
    %0 = vector.load %arg3[%c0, %c0_0, %c0_1] : memref<1x8x32xf32, #tpu.memory_space<vmem>>, vector<1x8x32xf32>
    %1 = vector.shape_cast %0 : vector<1x8x32xf32> to vector<8x32xf32>
    %c0_2 = arith.constant 0 : index
    %c0_3 = arith.constant 0 : index
    %2 = vector.load %arg4[%c0_2, %c0_3] : memref<32x32xf32, #tpu.memory_space<vmem>>, vector<32x32xf32>
    %cst = arith.constant dense<0.000000e+00> : vector<8x32xf32>
    %3 = tpu.matmul %1, %2, %cst {dimension_numbers = #tpu.dot_dimension_numbers<[1], [0], [0], [1], [0, 0, 1, 1], [], []>} : vector<8x32xf32>, vector<32x32xf32>, vector<8x32xf32> -> vector<8x32xf32>
    %c0_4 = arith.constant 0 : index
    %c0_5 = arith.constant 0 : index
    %c0_6 = arith.constant 0 : index
    %4 = vector.load %arg2[%c0_4, %c0_5, %c0_6] : memref<1x1x32xf32, #tpu.memory_space<vmem>>, vector<1x1x32xf32>
    %5 = vector.shape_cast %4 : vector<1x1x32xf32> to vector<1x32xf32>
    %6 = vector.broadcast %5 : vector<1x32xf32> to vector<8x32xf32>
    %7 = arith.addf %3, %6 : vector<8x32xf32>
    %cst_7 = arith.constant 0.00999999977 : f32
    %8 = vector.broadcast %cst_7 : f32 to vector<8x32xf32>
    %9 = arith.mulf %8, %7 : vector<8x32xf32>
    %10 = arith.maximumf %7, %9 : vector<8x32xf32>
    %c0_8 = arith.constant 0 : index
    %c0_9 = arith.constant 0 : index
    %11 = vector.load %arg5[%c0_8, %c0_9] : memref<1x32xf32, #tpu.memory_space<vmem>>, vector<1x32xf32>
    %cst_10 = arith.constant dense<0.000000e+00> : vector<1x8xf32>
    %12 = tpu.matmul %11, %10, %cst_10 {dimension_numbers = #tpu.dot_dimension_numbers<[1], [1], [0], [0], [0, 0, 1, 0], [], []>} : vector<1x32xf32>, vector<8x32xf32>, vector<1x8xf32> -> vector<1x8xf32>
    %c0_11 = arith.constant 0 : index
    %c0_12 = arith.constant 0 : index
    %13 = vector.load %arg6[%c0_11, %c0_12] : memref<1x1xf32, #tpu.memory_space<vmem>>, vector<1x1xf32>
    %14 = vector.broadcast %13 : vector<1x1xf32> to vector<1x8xf32>
    %15 = arith.addf %12, %14 : vector<1x8xf32>
    %c0_13 = arith.constant 0 : index
    %c0_14 = arith.constant 0 : index
    %c0_15 = arith.constant 0 : index
    %16 = vector.load %arg7[%c0_13, %c0_14, %c0_15] : memref<1x1x8xf32, #tpu.memory_space<vmem>>, vector<1x1x8xf32>
    %17 = vector.shape_cast %16 : vector<1x1x8xf32> to vector<1x8xf32>
    %18 = vector.shape_cast %15 : vector<1x8xf32> to vector<1x1x8xf32>
    tpu.vector_store %arg7[%c0_13, %c0_14, %c0_15], %18 {strides = array<i32>} : memref<1x1x8xf32, #tpu.memory_space<vmem>>, vector<1x1x8xf32>,
    return
  }
  func.func @transform_0(%arg0: i32, %arg1: i32) -> (i32, i32, i32) {
    %c0_i32 = arith.constant 0 : i32
    %c0_i32_0 = arith.constant 0 : i32
    %c0_i32_1 = arith.constant 0 : i32
    return %arg0, %c0_i32, %c0_i32_0 : i32, i32, i32
  }
  func.func @transform_1(%arg0: i32, %arg1: i32) -> (i32, i32, i32) {
    %c0_i32 = arith.constant 0 : i32
    %c0_i32_0 = arith.constant 0 : i32
    return %arg0, %arg1, %c0_i32 : i32, i32, i32
  }
  func.func @transform_2(%arg0: i32, %arg1: i32) -> (i32, i32) {
    %c0_i32 = arith.constant 0 : i32
    %c0_i32_0 = arith.constant 0 : i32
    %c0_i32_1 = arith.constant 0 : i32
    return %c0_i32, %c0_i32_0 : i32, i32
  }
  func.func @transform_3(%arg0: i32, %arg1: i32) -> (i32, i32) {
    %c0_i32 = arith.constant 0 : i32
    %c0_i32_0 = arith.constant 0 : i32
    %c0_i32_1 = arith.constant 0 : i32
    return %c0_i32, %c0_i32_0 : i32, i32
  }
  func.func @transform_4(%arg0: i32, %arg1: i32) -> (i32, i32) {
    %c0_i32 = arith.constant 0 : i32
    %c0_i32_0 = arith.constant 0 : i32
    %c0_i32_1 = arith.constant 0 : i32
    return %c0_i32, %c0_i32_0 : i32, i32
  }
  func.func @transform_5(%arg0: i32, %arg1: i32) -> (i32, i32, i32) {
    %c0_i32 = arith.constant 0 : i32
    %c0_i32_0 = arith.constant 0 : i32
    return %arg0, %c0_i32, %arg1 : i32, i32, i32
  }
}

module attributes {stable_mosaic.version = 11 : i64} {
  func.func @_score_kernel(%arg0: i32, %arg1: i32, %arg2: memref<1x1x32xf32, #tpu.memory_space<vmem>>, %arg3: memref<1x8x32xf32, #tpu.memory_space<vmem>>, %arg4: memref<32x32xf32, #tpu.memory_space<vmem>>, %arg5: memref<1x32xf32, #tpu.memory_space<vmem>>, %arg6: memref<1x1xf32, #tpu.memory_space<vmem>>, %arg7: memref<1x1x8xf32, #tpu.memory_space<vmem>>) attributes {dimension_semantics = [#tpu.dimension_semantics<parallel>, #tpu.dimension_semantics<parallel>], iteration_bounds = array<i64: 2, 1>, scalar_prefetch = 0 : i64, scratch_operands = 0 : i64, tpu.core_type = #tpu.core_type<tc>, window_params = [{transform_indices = @transform_0, window_bounds = array<i64: 1, 1, 32>}, {transform_indices = @transform_1, window_bounds = array<i64: 1, 8, 32>}, {pipeline_mode = #tpu.pipeline_mode<synchronous>, transform_indices = @transform_2, window_bounds = array<i64: 32, 32>}, {pipeline_mode = #tpu.pipeline_mode<synchronous>, transform_indices = @transform_3, window_bounds = array<i64: 1, 32>}, {pipeline_mode = #tpu.pipeline_mode<synchronous>, transform_indices = @transform_4, window_bounds = array<i64: 1, 1>}, {transform_indices = @transform_5, window_bounds = array<i64: 1, 1, 8>}]} {
    %c0 = arith.constant 0 : index
    %c0_0 = arith.constant 0 : index
    %c0_1 = arith.constant 0 : index
    %0 = vector.load %arg3[%c0, %c0_0, %c0_1] : memref<1x8x32xf32, #tpu.memory_space<vmem>>, vector<1x8x32xf32>
    %1 = vector.shape_cast %0 : vector<1x8x32xf32> to vector<8x32xf32>
    %c0_2 = arith.constant 0 : index
    %c0_3 = arith.constant 0 : index
    %2 = vector.load %arg4[%c0_2, %c0_3] : memref<32x32xf32, #tpu.memory_space<vmem>>, vector<32x32xf32>
    %cst = arith.constant dense<0.000000e+00> : vector<8x32xf32>
    %3 = tpu.matmul %1, %2, %cst {dimension_numbers = #tpu.dot_dimension_numbers<[1], [0], [0], [1], [0, 0, 1, 1], [], []>} : vector<8x32xf32>, vector<32x32xf32>, vector<8x32xf32> -> vector<8x32xf32>
    %c0_4 = arith.constant 0 : index
    %c0_5 = arith.constant 0 : index
    %c0_6 = arith.constant 0 : index
    %4 = vector.load %arg2[%c0_4, %c0_5, %c0_6] : memref<1x1x32xf32, #tpu.memory_space<vmem>>, vector<1x1x32xf32>
    %5 = vector.shape_cast %4 : vector<1x1x32xf32> to vector<1x32xf32>
    %6 = vector.broadcast %5 : vector<1x32xf32> to vector<8x32xf32>
    %7 = arith.addf %3, %6 : vector<8x32xf32>
    %cst_7 = arith.constant 0.00999999977 : f32
    %8 = vector.broadcast %cst_7 : f32 to vector<8x32xf32>
    %9 = arith.mulf %8, %7 : vector<8x32xf32>
    %10 = arith.maximumf %7, %9 : vector<8x32xf32>
    %c0_8 = arith.constant 0 : index
    %c0_9 = arith.constant 0 : index
    %11 = vector.load %arg5[%c0_8, %c0_9] : memref<1x32xf32, #tpu.memory_space<vmem>>, vector<1x32xf32>
    %cst_10 = arith.constant dense<0.000000e+00> : vector<1x8xf32>
    %12 = tpu.matmul %11, %10, %cst_10 {dimension_numbers = #tpu.dot_dimension_numbers<[1], [1], [0], [0], [0, 0, 1, 0], [], []>} : vector<1x32xf32>, vector<8x32xf32>, vector<1x8xf32> -> vector<1x8xf32>
    %c0_11 = arith.constant 0 : index
    %c0_12 = arith.constant 0 : index
    %13 = vector.load %arg6[%c0_11, %c0_12] : memref<1x1xf32, #tpu.memory_space<vmem>>, vector<1x1xf32>
    %14 = vector.broadcast %13 : vector<1x1xf32> to vector<1x8xf32>
    %15 = arith.addf %12, %14 : vector<1x8xf32>
    %c0_13 = arith.constant 0 : index
    %c0_14 = arith.constant 0 : index
    %c0_15 = arith.constant 0 : index
    %16 = vector.load %arg7[%c0_13, %c0_14, %c0_15] : memref<1x1x8xf32, #tpu.memory_space<vmem>>, vector<1x1x8xf32>
    %17 = vector.shape_cast %16 : vector<1x1x8xf32> to vector<1x8xf32>
    %18 = vector.shape_cast %15 : vector<1x8xf32> to vector<1x1x8xf32>
    tpu.vector_store %arg7[%c0_13, %c0_14, %c0_15], %18 {strides = array<i32>} : memref<1x1x8xf32, #tpu.memory_space<vmem>>, vector<1x1x8xf32>,
    return
  }
  func.func @transform_0(%arg0: i32, %arg1: i32) -> (i32, i32, i32) {
    %c0_i32 = arith.constant 0 : i32
    %c0_i32_0 = arith.constant 0 : i32
    %c0_i32_1 = arith.constant 0 : i32
    return %arg0, %c0_i32, %c0_i32_0 : i32, i32, i32
  }
  func.func @transform_1(%arg0: i32, %arg1: i32) -> (i32, i32, i32) {
    %c0_i32 = arith.constant 0 : i32
    %c0_i32_0 = arith.constant 0 : i32
    return %arg0, %arg1, %c0_i32 : i32, i32, i32
  }
  func.func @transform_2(%arg0: i32, %arg1: i32) -> (i32, i32) {
    %c0_i32 = arith.constant 0 : i32
    %c0_i32_0 = arith.constant 0 : i32
    %c0_i32_1 = arith.constant 0 : i32
    return %c0_i32, %c0_i32_0 : i32, i32
  }
  func.func @transform_3(%arg0: i32, %arg1: i32) -> (i32, i32) {
    %c0_i32 = arith.constant 0 : i32
    %c0_i32_0 = arith.constant 0 : i32
    %c0_i32_1 = arith.constant 0 : i32
    return %c0_i32, %c0_i32_0 : i32, i32
  }
  func.func @transform_4(%arg0: i32, %arg1: i32) -> (i32, i32) {
    %c0_i32 = arith.constant 0 : i32
    %c0_i32_0 = arith.constant 0 : i32
    %c0_i32_1 = arith.constant 0 : i32
    return %c0_i32, %c0_i32_0 : i32, i32
  }
  func.func @transform_5(%arg0: i32, %arg1: i32) -> (i32, i32, i32) {
    %c0_i32 = arith.constant 0 : i32
    %c0_i32_0 = arith.constant 0 : i32
    return %arg0, %c0_i32, %arg1 : i32, i32, i32
  }
}

</mosaic_0001>

<bundles_post_ra>
// kernel: tpu_custom_call.1
= control target key start
LH: loop header
LB: loop body
LE: loop exit
PB: predicated region body
PF: predicated region fallthrough
CT: control target
= control target key end

     0   :  { %s1058_s0 = inlined_call_operand.vmem [shape: f32[2,1,32], index: 0, kind: input, shape index: {}]   ;;  %s1059_s1 = inlined_call_operand.hbm [shape: f32[2,8,32], index: 1, kind: input, shape index: {}]   ;;  %s1060_s2 = inlined_call_operand.hbm [shape: f32[32,32], index: 2, kind: input, shape index: {}]   ;;  %s1061_s3 = inlined_call_operand.vmem [shape: f32[1,32], index: 3, kind: input, shape index: {}]   ;;  %s1062_s4 = inlined_call_operand.<no memory space> [shape: f32[1,1], index: 4, kind: input, shape index: {}]   ;;  %s1063_s5 = inlined_call_operand.hbm [shape: f32[2,1,8], index: 5, kind: output, shape index: {}]  }
   0x1   :  { %1065 = sst [smem:[#allocation12_spill]] %s1060_s2  ;;  %v10_v0 = vstv %s1062_s4 }
   0x2   :  { %11 = vst [vmem:[#allocation2] sm:$0x1] %v10_v0 }
   0x3   :  { %12 = vsyncpa [#allocation4], 0 }
   0x4   :  { %14 = vsyncpa [#allocation4 + $0x1], 0 }
   0x5   :  { %15 = vsyncpa [#allocation7], 0 }
   0x6   :  { %16 = vsyncpa [#allocation5], 0 }
   0x7   :  { %18 = vsyncpa [#allocation5 + $0x1], 0  ;;  %s873_s20 = smov 0   ;;  %s875_s21 = smov 0  }
   0x8   :  { %s877_s22 = smov 0   ;;  %s879_s23 = smov 0  }
   0x9   :  { %s881_s24 = smov 0   ;;  %s883_s25 = smov 0  }
   0xa LB: > { %s573_s4 = sadd.s32 4294967295, %s830_s25   ;;  %s574_s26 = sadd.s32 4294967294, %s830_s25   ;;  %s830_s25 = sphi %s883_s25, %s24_s25   ;;  %s826_s24 = sphi %s881_s24, %s1083_s24   ;;  %s822_s23 = sphi %s879_s23, %s1082_s23   ;;  %s818_s22 = sphi %s877_s22, %s1081_s22   ;;  %s814_s21 = sphi %s875_s21, %s1080_s21   ;;  %s810_s20 = sphi %s873_s20, %s1079_s20  }
   0xb   : > { %p84_p0 = scmp.ne.s32.totalorder %s814_s21, %s810_s20  ;;  %p907_p1 = scmp.eq.s32.totalorder %s573_s4, 0 }
   0xc   : > { %p911_p2 = scmp.eq.s32.totalorder %s573_s4, 1  ;;  %p179_p3 = scmp.eq.s32.totalorder %s574_s26, 1 }
   0xd   : > { %p917_p4 = por %p907_p1, %p84_p0  ;;  %p575_p5 = scmp.ge.s32.totalorder %s830_s25, 1 }
   0xe   : > { %p922_p6 = por %p179_p3, %p84_p0  ;;  %p186_p7 = scmp.lt.s32.totalorder %s830_s25, 3 }
   0xf   : > { %s1068_s29 = scalar_select %p917_p4, 1, 0 }
  0x10   : > { %s1069_s30 = scalar_select %p922_p6, 1, 0 }
  0x11   : > { %p927_p8 = pnand %p575_p5, %p186_p7  ;;  %s832_s7 = smov [#allocation6]  }
  0x12   : > { %s198_s8 = sshll.u32 %s832_s7, 4  ;;  %s36_s10 = sadd.s32 1, %s826_s24  ;;  %s199_s8 = int_to_ptr.vmem [resolvable:$true] %s198_s8 }
  0x13   : > { %p621_p9 = pneg %p927_p8  ;;  %s703_s11 = scalar_lea.vmem %s199_s8, 512 }
  0x14   : > { %p704_p13 = scmp.ne.s32.totalorder %s199_s8, %s703_s11  ;;  %p711_p5 = scmp.lt.s32.totalorder %s199_s8, %s199_s8 }
  0x15   : > { %p936_p11 = pnand %p621_p9, %p907_p1  ;;  %p712_p7 = scmp.lt.s32.totalorder %s703_s11, %s703_s11 }
  0x17   : > { %p694_p12 = pneg %p936_p11  ;;  %p713_p6 = por %p712_p7, %p711_p5 }
  0x19   : > { %p706_p0 = pnand %p704_p13, %p694_p12 }
  0x1b   : > { %p707_p3 = pneg %p706_p0 }
  0x1d   : > { %p714_p4 = pnand %p713_p6, %p707_p3 }
  0x1f   : > { %717 = shalt.err (!%p714_p4)
}
  0x20   : > { %s833_s12 = smov 128   ;;  %s834_s13 = smov 8  }
  0x21   : > { %s1072_s2 = sld [smem:[#allocation12_spill]]  ;;  %p38_p6 = scmp.ge.s32.totalorder %s36_s10, 2 }
  0x22   : > { %s71_s16 = sadd.s32 1, %s818_s22  ;;  %p78_p4 = scmp.ne.s32.totalorder %s818_s22, %s814_s21 }
  0x23   : > { %p79_p9 = scmp.eq.s32.totalorder %s830_s25, 0  ;;  %s1085_s10 = smov (%p38_p6, %s36_s10), 0 }
  0x24   : > { %p960_p13 = por %p911_p2, %p78_p4  ;;  %s66_s19 = ssub.s32 %s826_s24, %s1085_s10 }
  0x25   : > { %p954_p12 = por %p79_p9, %p78_p4  ;;  %p634_p0 = scmp.lt.s32.totalorder %s830_s25, 2 }
  0x26   : > { %s224_s4 = sand.u32 1, %s818_s22  }
  0x27   : > { %624 = dma.hbm_to_vmem [thread:$0]  (!%p936_p11), %s1072_s2, 512, %s199_s8, [#allocation7], %s833_s12, %s833_s12, %s834_s13  }
  0x28   : > { %p69_p11 = scmp.eq.s32.totalorder %s66_s19, 0  ;;  %s578_s26 = sshll.u32 %s224_s4, 3 }
  0x29   : > { %s579_s8 = sshll.u32 %s826_s24, 7  ;;  %s228_s13 = scalar_lea.vmem [#allocation3], %s578_s26 }
  0x2a   : > { %s969_s7 = scalar_select %p69_p11, %s818_s22, %s71_s16  }
  0x2b   : > { %s234_s12 = scalar_lea.hbm %s1059_s1, %s579_s8  ;;  %s236_s14 = sshll.u32 %s228_s13, 4  ;;  %s237_s14 = int_to_ptr.vmem [resolvable:$true] %s236_s14 }
  0x2c   : > { %p977_p2 = pnand %p634_p0, %p954_p12  ;;  %s225_s15 = scalar_lea.sflag [#allocation4], %s224_s4 }
  0x2d   : > { %s731_s19 = scalar_lea.vmem %s237_s14, 128  ;;  %s835_s16 = smov [#allocation3]  }
  0x2e   : > { %p720_p3 = pneg %p977_p2  ;;  %p732_p5 = scmp.ne.s32.totalorder %s237_s14, %s731_s19 }
  0x2f   : > { %s736_s2 = sshll.u32 %s835_s16, 4  ;;  %s737_s2 = int_to_ptr.vmem [resolvable:$false] %s736_s2 }
  0x30   : > { %p734_p7 = pnand %p732_p5, %p720_p3  ;;  %s738_s8 = scalar_lea.vmem %s737_s2, 256 }
  0x31   : > { %p739_p4 = scmp.lt.s32.totalorder %s237_s14, %s737_s2  ;;  %p740_p9 = scmp.lt.s32.totalorder %s738_s8, %s731_s19 }
  0x32   : > { %p735_p6 = pneg %p734_p7 }
  0x33   : > { %p741_p11 = por %p740_p9, %p739_p4 }
  0x35   : > { %p742_p10 = pnand %p741_p11, %p735_p6 }
  0x37   : > { %745 = shalt.err (!%p742_p10)
}
  0x38   : > { %628 = dma.hbm_to_vmem [thread:$0]  (!%p977_p2), %s234_s12, 128, %s237_s14, %s225_s15  }
  0x39   : > { %245 = sbr.rel (%p927_p8) target bundleno = 485 (0x1e5), region = 40  ;;  %s988_s17 = sand.u32 (!%p927_p8), 1, %s814_s21  }
  0x3a   : > { %s581_s4 = sshll.u32 (!%p927_p8), %s988_s17, 3  ;;  %s248_s26 = scalar_lea.sflag (!%p927_p8), [#allocation4], %s988_s17 }
  0x3b   : > { %s251_s9 = scalar_lea.vmem (!%p927_p8), [#allocation3], %s581_s4  ;;  %p1076_p12 = scmp.ne.s32.totalorder (!%p927_p8), %s1068_s29, 0 }
  0x3e   : > { %797 = dma.done.wait (%p1076_p12), %s248_s26, 128  }
  0x3f   : > { %799 = vsyncadd (%p1076_p12), %s248_s26, 4294967168 }
  0x40   : > { %801 = dma.done.wait (%p907_p1), [#allocation7], 512  }
  0x41   : > { %803 = vsyncadd (%p907_p1), [#allocation7], 4294966784  ;;  %v836_v1 = vmov 0.0   ;;  %vm837_vm0 = vmmov 0   ;;  %v291_v2 = vld [vmem:[#allocation6 + $0x18] sm:$0xff]  ;;  %v290_v3 = vld [vmem:[#allocation6 + $0x10] sm:$0xff]  ;;  %v382_v16 = vlaneseq }
  0x42   : > { %597 = vmatprep.subr.mxu0 %v836_v1  ;;  %605 = vmatprep.mubr.msk.f32.mxu0 %vm837_vm0, %v836_v1  ;;  %v289_v4 = vld [vmem:[#allocation6 + $0x8] sm:$0xff]  ;;  %v288_v5 = vld [vmem:[#allocation6] sm:$0xff]  ;;  %v287_v6 = vld [vmem:[%s251_s9] sm:$0xff]  ;;  %vm299_vm1 = vcmask 261120   ;;  %v838_v8 = vmov 0   ;;  %p284_p1 = scmp.lt.s32.totalorder %s822_s23, 1 }
  0x43   : > { %608 = vmatprep.subr.mxu1 %v836_v1  ;;  %610 = vmatprep.mubr.msk.f32.mxu1 %vm837_vm0, %v836_v1  ;;  %v376_v7 = vld [vmem:[#allocation2] sm:$0x1]  ;;  %v383_v17 = vshrl.u32 %v382_v16, 7  ;;  %s587_s13 = sshll.u32 %s822_s23, 4  ;;  %s283_s14 = scalar_lea.vmem [#allocation8], %s988_s17  ;;  %vm462_vm2 = vcmask 57344  }
  0x44   : > { %598 = vmatpush3.msra.mxu0 %v291_v2  ;;  %691 = vset.pattern.permute.xlu0 %v838_v8  ;;  %s285_s2 = scalar_select %p284_p1, %s822_s23, 1  ;;  %v375_v15 = vld [vmem:[%s1061_s3] sm:$0x1] }
  0x45   : > { %599 = vmatprep.subr.mxu0 %v836_v1  ;;  %379 = vperm.xlu0 %691, %v376_v7   ;;  %v384_v18 = vsub.s32 0, %v383_v17  ;;  %s478_s28 = sshll.u32 %s283_s14, 4  ;;  %s1016_s16 = scalar_lea.hbm %s1063_s5, %s587_s13  ;;  %s479_s28 = int_to_ptr.vmem [resolvable:$true] %s478_s28 }
  0x46   : > { %600 = vmatpush3.msra.mxu0 %v290_v3  ;;  %s286_s6 = scalar_lea.vmem %s1058_s0, %s285_s2  ;;  %s465_s8 = scalar_lea.sflag [#allocation5], %s988_s17 }
  0x47   : > { %601 = vmatprep.subr.mxu0 %v836_v1  ;;  %v583_v9 = vld [vmem:[%s286_s6] ss:$0 sm:$0xff]  ;;  %s746_s4 = scalar_lea.vmem %s479_s28, 16  ;;  %s839_s23 = smov [#allocation8]  }
  0x48   : > { %602 = vmatpush3.msra.mxu0 %v289_v4  ;;  %p747_p8 = scmp.ne.s32.totalorder %s479_s28, %s746_s4  ;;  %s750_s26 = sshll.u32 %s839_s23, 4  ;;  %s751_s26 = int_to_ptr.vmem [resolvable:$false] %s750_s26 }
  0x49   : > { %603 = vmatprep.subr.mxu0 %v836_v1  ;;  %s752_s9 = scalar_lea.vmem %s751_s26, 32  ;;  %p753_p2 = scmp.lt.s32.totalorder %s479_s28, %s751_s26 }
  0x4a   : > { %604 = vmatpush3.msra.mxu0 %v288_v5  ;;  %p748_p10 = pnand %p747_p8, %p960_p13  ;;  %p754_p3 = scmp.lt.s32.totalorder %s752_s9, %s746_s4 }
  0x4b   : > { %606 = vmatmul.mubr.msk.f32.vlgmr.msra.gmra.mxu0 %vm299_vm1, %v287_v6 }
  0x4c   : > { %p749_p0 = pneg %p748_p10  ;;  %p755_p5 = por %p754_p3, %p753_p2 }
  0x4e   : > { %p756_p7 = pnand %p755_p5, %p749_p0 }
  0xc0   : > { %v380_v19 = vpop.permute.xlu0 %379 }
  0xc1   : > { %v385_v20 = vrot.slane %v380_v19, %v384_v18 }
 0x10b   : > { %v369_v10 = vpop.f32.mrf.mxu0 }
 0x10c   : > { %v370_v11 = vadd.f32 %v583_v9, %v369_v10 }
 0x10d   : > { %v607_v12 = vpop.f32.mrf.mxu0 }
 0x10e   : > { %v373_v13 = vmul.f32 0.01, %v370_v11 }
 0x110   : > { %v374_v14 = vmax.f32 %v370_v11, %v373_v13 }
 0x112   : > { %609 = vmatpush3.xpose.msk.msra.mxu1 %vm299_vm1, %v374_v14 }
 0x115   : > { %611 = vmatmul.mubr.msk.f32.vlgmr.msra.gmra.mxu1 %vm299_vm1, %v375_v15 }
 0x1d5   : > { %v458_v21 = vpop.f32.mrf.mxu1 }
 0x1d6   : > { %v459_v22 = vadd.f32 %v458_v21, %v385_v20 }
 0x1d7   : > { %v612_v23 = vpop.f32.mrf.mxu1 }
 0x1d8   : > { %463 = vst.msk [vmem:[%s283_s14] sm:$0x1] %vm462_vm2, %v459_v22 }
 0x1d9   : > { %759 = shalt.err (!%p756_p7)
}
 0x1da   : > { %s760_s2 = scalar_lea.hbm %s1016_s16, 16  ;;  %s764_s29 = scalar_lea.hbm %s1063_s5, 32 }
 0x1db   : > { %p761_p6 = scmp.ne.s32.totalorder %s1016_s16, %s760_s2  ;;  %p765_p11 = scmp.lt.s32.totalorder %s1016_s16, %s1063_s5 }
 0x1dc   : > { %p766_p12 = scmp.lt.s32.totalorder %s764_s29, %s760_s2 }
 0x1dd   : > { %p762_p4 = pnand %p761_p6, %p960_p13 }
 0x1de   : > { %p767_p1 = por %p766_p12, %p765_p11 }
 0x1df   : > { %p763_p9 = pneg %p762_p4 }
 0x1e1   : > { %p768_p8 = pnand %p767_p1, %p763_p9 }
 0x1e3   : > { %771 = shalt.err (!%p768_p8)
}
 0x1e4   : > { %619 = dma.vmem_to_hbm [thread:$0]  (%p960_p13), %s479_s28, 16, %s1016_s16, %s465_s8  }
 0x1e5 PF: > { %s490_s12 = sand.u32 1, %s810_s20   ;;  %p1077_p10 = scmp.ne.s32.totalorder %s1069_s30, 0 }
 0x1e6   : > { %p1078_p0 = scmp.ge.s32.totalorder %s830_s25, 2  ;;  %s491_s13 = scalar_lea.sflag [#allocation5], %s490_s12 }
 0x1e8   : > { %p630_p2 = pnand %p1078_p0, %p1077_p10 }
 0x1ea   : > { %p631_p3 = pneg %p630_p2 }
 0x1ec   : > { %805 = dma.done.wait (%p631_p3), %s491_s13, 16  }
 0x1ed   : > { %807 = vsyncadd (%p631_p3), %s491_s13, 4294967280  ;;  %s24_s25 = sadd.s32 1, %s830_s25   ;;  %s1079_s20 = smov %s814_s21 }
 0x1ee   : > { %p21_p5 = scmp.ge.s32.totalorder %s24_s25, 4   ;;  %s1080_s21 = smov %s818_s22 }
 0x1ef   : > { %s1081_s22 = smov %s969_s7  ;;  %s1082_s23 = smov %s826_s24 }
 0x1f0   : > { %s1083_s24 = smov %s1085_s10  ;;  %23 = sbr.rel (!%p21_p5) target bundleno = 10 (0xa), region = 92 }
 0x1f5   :  { %495 = vsyncpa [#allocation4], 1 }
 0x1f6   :  { %497 = vsyncpa [#allocation4 + $0x1], 1 }
 0x1f7   :  { %498 = vsyncpa [#allocation7], 1 }
 0x1f8   :  { %499 = vsyncpa [#allocation5], 1 }
 0x1f9   :  { %501 = vsyncpa [#allocation5 + $0x1], 1 }

// kernel: tpu_custom_call.1
= control target key start
LH: loop header
LB: loop body
LE: loop exit
PB: predicated region body
PF: predicated region fallthrough
CT: control target
= control target key end

     0   :  { %s1058_s0 = inlined_call_operand.vmem [shape: f32[2,1,32], index: 0, kind: input, shape index: {}]   ;;  %s1059_s1 = inlined_call_operand.hbm [shape: f32[2,8,32], index: 1, kind: input, shape index: {}]   ;;  %s1060_s2 = inlined_call_operand.hbm [shape: f32[32,32], index: 2, kind: input, shape index: {}]   ;;  %s1061_s3 = inlined_call_operand.vmem [shape: f32[1,32], index: 3, kind: input, shape index: {}]   ;;  %s1062_s4 = inlined_call_operand.<no memory space> [shape: f32[1,1], index: 4, kind: input, shape index: {}]   ;;  %s1063_s5 = inlined_call_operand.hbm [shape: f32[2,1,8], index: 5, kind: output, shape index: {}]  }
   0x1   :  { %1065 = sst [smem:[#allocation12_spill]] %s1060_s2  ;;  %v10_v0 = vstv %s1062_s4 }
   0x2   :  { %11 = vst [vmem:[#allocation2] sm:$0x1] %v10_v0 }
   0x3   :  { %12 = vsyncpa [#allocation4], 0 }
   0x4   :  { %14 = vsyncpa [#allocation4 + $0x1], 0 }
   0x5   :  { %15 = vsyncpa [#allocation7], 0 }
   0x6   :  { %16 = vsyncpa [#allocation5], 0 }
   0x7   :  { %18 = vsyncpa [#allocation5 + $0x1], 0  ;;  %s873_s20 = smov 0   ;;  %s875_s21 = smov 0  }
   0x8   :  { %s877_s22 = smov 0   ;;  %s879_s23 = smov 0  }
   0x9   :  { %s881_s24 = smov 0   ;;  %s883_s25 = smov 0  }
   0xa LB: > { %s573_s4 = sadd.s32 4294967295, %s830_s25   ;;  %s574_s26 = sadd.s32 4294967294, %s830_s25   ;;  %s830_s25 = sphi %s883_s25, %s24_s25   ;;  %s826_s24 = sphi %s881_s24, %s1083_s24   ;;  %s822_s23 = sphi %s879_s23, %s1082_s23   ;;  %s818_s22 = sphi %s877_s22, %s1081_s22   ;;  %s814_s21 = sphi %s875_s21, %s1080_s21   ;;  %s810_s20 = sphi %s873_s20, %s1079_s20  }
   0xb   : > { %p84_p0 = scmp.ne.s32.totalorder %s814_s21, %s810_s20  ;;  %p907_p1 = scmp.eq.s32.totalorder %s573_s4, 0 }
   0xc   : > { %p911_p2 = scmp.eq.s32.totalorder %s573_s4, 1  ;;  %p179_p3 = scmp.eq.s32.totalorder %s574_s26, 1 }
   0xd   : > { %p917_p4 = por %p907_p1, %p84_p0  ;;  %p575_p5 = scmp.ge.s32.totalorder %s830_s25, 1 }
   0xe   : > { %p922_p6 = por %p179_p3, %p84_p0  ;;  %p186_p7 = scmp.lt.s32.totalorder %s830_s25, 3 }
   0xf   : > { %s1068_s29 = scalar_select %p917_p4, 1, 0 }
  0x10   : > { %s1069_s30 = scalar_select %p922_p6, 1, 0 }
  0x11   : > { %p927_p8 = pnand %p575_p5, %p186_p7  ;;  %s832_s7 = smov [#allocation6]  }
  0x12   : > { %s198_s8 = sshll.u32 %s832_s7, 4  ;;  %s36_s10 = sadd.s32 1, %s826_s24  ;;  %s199_s8 = int_to_ptr.vmem [resolvable:$true] %s198_s8 }
  0x13   : > { %p621_p9 = pneg %p927_p8  ;;  %s703_s11 = scalar_lea.vmem %s199_s8, 512 }
  0x14   : > { %p704_p13 = scmp.ne.s32.totalorder %s199_s8, %s703_s11  ;;  %p711_p5 = scmp.lt.s32.totalorder %s199_s8, %s199_s8 }
  0x15   : > { %p936_p11 = pnand %p621_p9, %p907_p1  ;;  %p712_p7 = scmp.lt.s32.totalorder %s703_s11, %s703_s11 }
  0x17   : > { %p694_p12 = pneg %p936_p11  ;;  %p713_p6 = por %p712_p7, %p711_p5 }
  0x19   : > { %p706_p0 = pnand %p704_p13, %p694_p12 }
  0x1b   : > { %p707_p3 = pneg %p706_p0 }
  0x1d   : > { %p714_p4 = pnand %p713_p6, %p707_p3 }
  0x1f   : > { %717 = shalt.err (!%p714_p4)
}
  0x20   : > { %s833_s12 = smov 128   ;;  %s834_s13 = smov 8  }
  0x21   : > { %s1072_s2 = sld [smem:[#allocation12_spill]]  ;;  %p38_p6 = scmp.ge.s32.totalorder %s36_s10, 2 }
  0x22   : > { %s71_s16 = sadd.s32 1, %s818_s22  ;;  %p78_p4 = scmp.ne.s32.totalorder %s818_s22, %s814_s21 }
  0x23   : > { %p79_p9 = scmp.eq.s32.totalorder %s830_s25, 0  ;;  %s1085_s10 = smov (%p38_p6, %s36_s10), 0 }
  0x24   : > { %p960_p13 = por %p911_p2, %p78_p4  ;;  %s66_s19 = ssub.s32 %s826_s24, %s1085_s10 }
  0x25   : > { %p954_p12 = por %p79_p9, %p78_p4  ;;  %p634_p0 = scmp.lt.s32.totalorder %s830_s25, 2 }
  0x26   : > { %s224_s4 = sand.u32 1, %s818_s22  }
  0x27   : > { %624 = dma.hbm_to_vmem [thread:$0]  (!%p936_p11), %s1072_s2, 512, %s199_s8, [#allocation7], %s833_s12, %s833_s12, %s834_s13  }
  0x28   : > { %p69_p11 = scmp.eq.s32.totalorder %s66_s19, 0  ;;  %s578_s26 = sshll.u32 %s224_s4, 3 }
  0x29   : > { %s579_s8 = sshll.u32 %s826_s24, 7  ;;  %s228_s13 = scalar_lea.vmem [#allocation3], %s578_s26 }
  0x2a   : > { %s969_s7 = scalar_select %p69_p11, %s818_s22, %s71_s16  }
  0x2b   : > { %s234_s12 = scalar_lea.hbm %s1059_s1, %s579_s8  ;;  %s236_s14 = sshll.u32 %s228_s13, 4  ;;  %s237_s14 = int_to_ptr.vmem [resolvable:$true] %s236_s14 }
  0x2c   : > { %p977_p2 = pnand %p634_p0, %p954_p12  ;;  %s225_s15 = scalar_lea.sflag [#allocation4], %s224_s4 }
  0x2d   : > { %s731_s19 = scalar_lea.vmem %s237_s14, 128  ;;  %s835_s16 = smov [#allocation3]  }
  0x2e   : > { %p720_p3 = pneg %p977_p2  ;;  %p732_p5 = scmp.ne.s32.totalorder %s237_s14, %s731_s19 }
  0x2f   : > { %s736_s2 = sshll.u32 %s835_s16, 4  ;;  %s737_s2 = int_to_ptr.vmem [resolvable:$false] %s736_s2 }
  0x30   : > { %p734_p7 = pnand %p732_p5, %p720_p3  ;;  %s738_s8 = scalar_lea.vmem %s737_s2, 256 }
  0x31   : > { %p739_p4 = scmp.lt.s32.totalorder %s237_s14, %s737_s2  ;;  %p740_p9 = scmp.lt.s32.totalorder %s738_s8, %s731_s19 }
  0x32   : > { %p735_p6 = pneg %p734_p7 }
  0x33   : > { %p741_p11 = por %p740_p9, %p739_p4 }
  0x35   : > { %p742_p10 = pnand %p741_p11, %p735_p6 }
  0x37   : > { %745 = shalt.err (!%p742_p10)
}
  0x38   : > { %628 = dma.hbm_to_vmem [thread:$0]  (!%p977_p2), %s234_s12, 128, %s237_s14, %s225_s15  }
  0x39   : > { %245 = sbr.rel (%p927_p8) target bundleno = 485 (0x1e5), region = 40  ;;  %s988_s17 = sand.u32 (!%p927_p8), 1, %s814_s21  }
  0x3a   : > { %s581_s4 = sshll.u32 (!%p927_p8), %s988_s17, 3  ;;  %s248_s26 = scalar_lea.sflag (!%p927_p8), [#allocation4], %s988_s17 }
  0x3b   : > { %s251_s9 = scalar_lea.vmem (!%p927_p8), [#allocation3], %s581_s4  ;;  %p1076_p12 = scmp.ne.s32.totalorder (!%p927_p8), %s1068_s29, 0 }
  0x3e   : > { %797 = dma.done.wait (%p1076_p12), %s248_s26, 128  }
  0x3f   : > { %799 = vsyncadd (%p1076_p12), %s248_s26, 4294967168 }
  0x40   : > { %801 = dma.done.wait (%p907_p1), [#allocation7], 512  }
  0x41   : > { %803 = vsyncadd (%p907_p1), [#allocation7], 4294966784  ;;  %v836_v1 = vmov 0.0   ;;  %vm837_vm0 = vmmov 0   ;;  %v291_v2 = vld [vmem:[#allocation6 + $0x18] sm:$0xff]  ;;  %v290_v3 = vld [vmem:[#allocation6 + $0x10] sm:$0xff]  ;;  %v382_v16 = vlaneseq }
  0x42   : > { %597 = vmatprep.subr.mxu0 %v836_v1  ;;  %605 = vmatprep.mubr.msk.f32.mxu0 %vm837_vm0, %v836_v1  ;;  %v289_v4 = vld [vmem:[#allocation6 + $0x8] sm:$0xff]  ;;  %v288_v5 = vld [vmem:[#allocation6] sm:$0xff]  ;;  %v287_v6 = vld [vmem:[%s251_s9] sm:$0xff]  ;;  %vm299_vm1 = vcmask 261120   ;;  %v838_v8 = vmov 0   ;;  %p284_p1 = scmp.lt.s32.totalorder %s822_s23, 1 }
  0x43   : > { %608 = vmatprep.subr.mxu1 %v836_v1  ;;  %610 = vmatprep.mubr.msk.f32.mxu1 %vm837_vm0, %v836_v1  ;;  %v376_v7 = vld [vmem:[#allocation2] sm:$0x1]  ;;  %v383_v17 = vshrl.u32 %v382_v16, 7  ;;  %s587_s13 = sshll.u32 %s822_s23, 4  ;;  %s283_s14 = scalar_lea.vmem [#allocation8], %s988_s17  ;;  %vm462_vm2 = vcmask 57344  }
  0x44   : > { %598 = vmatpush3.msra.mxu0 %v291_v2  ;;  %691 = vset.pattern.permute.xlu0 %v838_v8  ;;  %s285_s2 = scalar_select %p284_p1, %s822_s23, 1  ;;  %v375_v15 = vld [vmem:[%s1061_s3] sm:$0x1] }
  0x45   : > { %599 = vmatprep.subr.mxu0 %v836_v1  ;;  %379 = vperm.xlu0 %691, %v376_v7   ;;  %v384_v18 = vsub.s32 0, %v383_v17  ;;  %s478_s28 = sshll.u32 %s283_s14, 4  ;;  %s1016_s16 = scalar_lea.hbm %s1063_s5, %s587_s13  ;;  %s479_s28 = int_to_ptr.vmem [resolvable:$true] %s478_s28 }
  0x46   : > { %600 = vmatpush3.msra.mxu0 %v290_v3  ;;  %s286_s6 = scalar_lea.vmem %s1058_s0, %s285_s2  ;;  %s465_s8 = scalar_lea.sflag [#allocation5], %s988_s17 }
  0x47   : > { %601 = vmatprep.subr.mxu0 %v836_v1  ;;  %v583_v9 = vld [vmem:[%s286_s6] ss:$0 sm:$0xff]  ;;  %s746_s4 = scalar_lea.vmem %s479_s28, 16  ;;  %s839_s23 = smov [#allocation8]  }
  0x48   : > { %602 = vmatpush3.msra.mxu0 %v289_v4  ;;  %p747_p8 = scmp.ne.s32.totalorder %s479_s28, %s746_s4  ;;  %s750_s26 = sshll.u32 %s839_s23, 4  ;;  %s751_s26 = int_to_ptr.vmem [resolvable:$false] %s750_s26 }
  0x49   : > { %603 = vmatprep.subr.mxu0 %v836_v1  ;;  %s752_s9 = scalar_lea.vmem %s751_s26, 32  ;;  %p753_p2 = scmp.lt.s32.totalorder %s479_s28, %s751_s26 }
  0x4a   : > { %604 = vmatpush3.msra.mxu0 %v288_v5  ;;  %p748_p10 = pnand %p747_p8, %p960_p13  ;;  %p754_p3 = scmp.lt.s32.totalorder %s752_s9, %s746_s4 }
  0x4b   : > { %606 = vmatmul.mubr.msk.f32.vlgmr.msra.gmra.mxu0 %vm299_vm1, %v287_v6 }
  0x4c   : > { %p749_p0 = pneg %p748_p10  ;;  %p755_p5 = por %p754_p3, %p753_p2 }
  0x4e   : > { %p756_p7 = pnand %p755_p5, %p749_p0 }
  0xc0   : > { %v380_v19 = vpop.permute.xlu0 %379 }
  0xc1   : > { %v385_v20 = vrot.slane %v380_v19, %v384_v18 }
 0x10b   : > { %v369_v10 = vpop.f32.mrf.mxu0 }
 0x10c   : > { %v370_v11 = vadd.f32 %v583_v9, %v369_v10 }
 0x10d   : > { %v607_v12 = vpop.f32.mrf.mxu0 }
 0x10e   : > { %v373_v13 = vmul.f32 0.01, %v370_v11 }
 0x110   : > { %v374_v14 = vmax.f32 %v370_v11, %v373_v13 }
 0x112   : > { %609 = vmatpush3.xpose.msk.msra.mxu1 %vm299_vm1, %v374_v14 }
 0x115   : > { %611 = vmatmul.mubr.msk.f32.vlgmr.msra.gmra.mxu1 %vm299_vm1, %v375_v15 }
 0x1d5   : > { %v458_v21 = vpop.f32.mrf.mxu1 }
 0x1d6   : > { %v459_v22 = vadd.f32 %v458_v21, %v385_v20 }
 0x1d7   : > { %v612_v23 = vpop.f32.mrf.mxu1 }
 0x1d8   : > { %463 = vst.msk [vmem:[%s283_s14] sm:$0x1] %vm462_vm2, %v459_v22 }
 0x1d9   : > { %759 = shalt.err (!%p756_p7)
}
 0x1da   : > { %s760_s2 = scalar_lea.hbm %s1016_s16, 16  ;;  %s764_s29 = scalar_lea.hbm %s1063_s5, 32 }
 0x1db   : > { %p761_p6 = scmp.ne.s32.totalorder %s1016_s16, %s760_s2  ;;  %p765_p11 = scmp.lt.s32.totalorder %s1016_s16, %s1063_s5 }
 0x1dc   : > { %p766_p12 = scmp.lt.s32.totalorder %s764_s29, %s760_s2 }
 0x1dd   : > { %p762_p4 = pnand %p761_p6, %p960_p13 }
 0x1de   : > { %p767_p1 = por %p766_p12, %p765_p11 }
 0x1df   : > { %p763_p9 = pneg %p762_p4 }
 0x1e1   : > { %p768_p8 = pnand %p767_p1, %p763_p9 }
 0x1e3   : > { %771 = shalt.err (!%p768_p8)
}
 0x1e4   : > { %619 = dma.vmem_to_hbm [thread:$0]  (%p960_p13), %s479_s28, 16, %s1016_s16, %s465_s8  }
 0x1e5 PF: > { %s490_s12 = sand.u32 1, %s810_s20   ;;  %p1077_p10 = scmp.ne.s32.totalorder %s1069_s30, 0 }
 0x1e6   : > { %p1078_p0 = scmp.ge.s32.totalorder %s830_s25, 2  ;;  %s491_s13 = scalar_lea.sflag [#allocation5], %s490_s12 }
 0x1e8   : > { %p630_p2 = pnand %p1078_p0, %p1077_p10 }
 0x1ea   : > { %p631_p3 = pneg %p630_p2 }
 0x1ec   : > { %805 = dma.done.wait (%p631_p3), %s491_s13, 16  }
 0x1ed   : > { %807 = vsyncadd (%p631_p3), %s491_s13, 4294967280  ;;  %s24_s25 = sadd.s32 1, %s830_s25   ;;  %s1079_s20 = smov %s814_s21 }
 0x1ee   : > { %p21_p5 = scmp.ge.s32.totalorder %s24_s25, 4   ;;  %s1080_s21 = smov %s818_s22 }
 0x1ef   : > { %s1081_s22 = smov %s969_s7  ;;  %s1082_s23 = smov %s826_s24 }
 0x1f0   : > { %s1083_s24 = smov %s1085_s10  ;;  %23 = sbr.rel (!%p21_p5) target bundleno = 10 (0xa), region = 92 }
 0x1f5   :  { %495 = vsyncpa [#allocation4], 1 }
 0x1f6   :  { %497 = vsyncpa [#allocation4 + $0x1], 1 }
 0x1f7   :  { %498 = vsyncpa [#allocation7], 1 }
 0x1f8   :  { %499 = vsyncpa [#allocation5], 1 }
 0x1f9   :  { %501 = vsyncpa [#allocation5 + $0x1], 1 }

</bundles_post_ra>
